<compile_context>
chip_gen: v7x
topology: tpu7x:2x2x1
jax: 0.10.0
libtpu: 0.0.40
codegen_flags: <defaults>
</compile_context>

<pallas_src>
import functools

import jax
import jax.numpy as jnp
from jax.experimental import pallas as pl
from jax.experimental.pallas import tpu as pltpu


def _se_block_kernel(x_ref, w1t_ref, w2t_ref, out_ref, *, hw_true):
    # x_ref:   (1, C, HW_pad)  activation dtype (f32 or bf16)
    # w1t_ref: (C, C//r) f32   (transposed Linear weight -> y @ w1t == y @ W1^T)
    # w2t_ref: (C//r, C) f32
    x = x_ref[...]
    x32 = x.astype(jnp.float32)

    # Squeeze: global average pool over the (zero-padded) spatial/lane axis.
    # Zero padding does not perturb the sum; divide by the true H*W.
    y = jnp.sum(x32, axis=-1) / jnp.float32(hw_true)                    # (1, C)

    # Excitation: Linear -> ReLU -> Linear -> Sigmoid (tiny, kept in f32).
    h = jnp.dot(y, w1t_ref[...], preferred_element_type=jnp.float32)    # (1, C//r)
    h = jnp.maximum(h, 0.0)
    s = jnp.dot(h, w2t_ref[...], preferred_element_type=jnp.float32)    # (1, C)
    s = jax.nn.sigmoid(s)

    # Scale: broadcast the per-(batch, channel) gate across the spatial lanes.
    out_ref[...] = (x32 * s[:, :, None]).astype(out_ref.dtype)


def se_block(x_nchw, w1, w2):
    """x_nchw: (B, C, H, W). w1: (C//r, C). w2: (C, C//r). Returns (B, C, H, W).

    Works for f32 or bf16 activations; output dtype matches the input.
    """
    B, C, H, W = x_nchw.shape
    Cr = w1.shape[0]
    assert w1.shape == (Cr, C) and w2.shape == (C, Cr)

    hw = H * W
    # Lane-dense spatial axis: pad HW up to a multiple of 128 so stores are
    # full (unmasked) vst's rather than masked partial stores.
    hw_pad = max(128, ((hw + 127) // 128) * 128)

    x_flat = x_nchw.reshape(B, C, hw)
    if hw_pad != hw:
        x_flat = jnp.pad(x_flat, ((0, 0), (0, 0), (0, hw_pad - hw)))

    w1t = jnp.transpose(w1).astype(jnp.float32)      # (C, C//r)
    w2t = jnp.transpose(w2).astype(jnp.float32)      # (C//r, C)

    out_dtype = x_nchw.dtype
    itemsize = jnp.dtype(out_dtype).itemsize

    # VMEM budget: double-buffered x block (in + out) plus both weight tiles,
    # with a little headroom.  Clamp to a value that is safe on every
    # generation (v7x has only 64 MiB physical VMEM per TensorCore).
    block_bytes = C * hw_pad * itemsize
    weight_bytes = 2 * C * Cr * 4
    needed = 4 * block_bytes + weight_bytes + (2 << 20)
    vmem_limit = int(min(max(needed, 32 * 1024 * 1024), 48 * 1024 * 1024))
    # TODO(synk): for very large C*HW blocks that exceed the v7x budget, split
    # into a two-pass scheme (pass 1: pooled gate; pass 2: tiled x*s scale).

    cost = pl.CostEstimate(
        flops=2 * B * C * hw_pad + 4 * B * C * Cr,
        transcendentals=B * C,                       # sigmoid
        bytes_accessed=2 * B * C * hw_pad * itemsize + weight_bytes,
    )

    kernel = functools.partial(_se_block_kernel, hw_true=hw)

    out_flat = pl.pallas_call(
        kernel,
        out_shape=jax.ShapeDtypeStruct((B, C, hw_pad), out_dtype),
        grid=(B,),
        in_specs=[
            pl.BlockSpec((1, C, hw_pad), lambda b: (b, 0, 0)),
            pl.BlockSpec((C, Cr), lambda b: (0, 0)),
            pl.BlockSpec((Cr, C), lambda b: (0, 0)),
        ],
        out_specs=pl.BlockSpec((1, C, hw_pad), lambda b: (b, 0, 0)),
        compiler_params=pltpu.CompilerParams(
            dimension_semantics=("parallel",),       # shard batch over TCs on v7x
            vmem_limit_bytes=vmem_limit,
        ),
        cost_estimate=cost,
    )(x_flat, w1t, w2t)

    if hw_pad != hw:
        out_flat = out_flat[:, :, :hw]
    return out_flat.reshape(B, C, H, W)


def se_block_ref(x_nchw, w1, w2):
    """Pure-JAX reference mirroring the PyTorch forward."""
    y = jnp.mean(x_nchw.astype(jnp.float32), axis=(2, 3))     # (B, C)
    h = jnp.maximum(y @ w1.T.astype(jnp.float32), 0.0)        # (B, C//r)
    s = jax.nn.sigmoid(h @ w2.T.astype(jnp.float32))          # (B, C)
    return (x_nchw.astype(jnp.float32) * s[:, :, None, None]).astype(x_nchw.dtype)


if __name__ == "__main__":
    key = jax.random.PRNGKey(0)
    B, C, H, W = 2, 4, 16, 16
    r = 1  # reduction ratio (module default)

    kx, k1, k2, kx2 = jax.random.split(key, 4)
    x = jax.random.normal(kx, (B, C, H, W), dtype=jnp.float32)
    # nn.Linear(c, c//r, bias=False) weight: (c//r, c); Linear(c//r, c): (c, c//r)
    w1 = jax.random.normal(k1, (C // r, C), dtype=jnp.float32) * 0.1
    w2 = jax.random.normal(k2, (C, C // r), dtype=jnp.float32) * 0.1

    out = jax.block_until_ready(se_block(x, w1, w2))
    ref = se_block_ref(x, w1, w2)
    assert out.shape == (B, C, H, W)
    assert jnp.allclose(out, ref, atol=1e-5, rtol=1e-5), "mismatch vs reference (16x16)"

    # Non-multiple-of-128 spatial size (exercises the lane-padding path,
    # e.g. 7x7 feature maps in late ResNet stages).
    x2 = jax.random.normal(kx2, (B, C, 7, 7), dtype=jnp.float32)
    out2 = jax.block_until_ready(se_block(x2, w1, w2))
    ref2 = se_block_ref(x2, w1, w2)
    assert out2.shape == (B, C, 7, 7)
    assert jnp.allclose(out2, ref2, atol=1e-5, rtol=1e-5), "mismatch vs reference (7x7)"

    print("KERNEL_OK")
</pallas_src>

<mosaic_0001>
module attributes {stable_mosaic.version = 11 : i64} {
  func.func @_se_block_kernel(%arg0: i32, %arg1: memref<1x4x256xf32, #tpu.memory_space<vmem>>, %arg2: memref<4x4xf32, #tpu.memory_space<vmem>>, %arg3: memref<4x4xf32, #tpu.memory_space<vmem>>, %arg4: memref<1x4x256xf32, #tpu.memory_space<vmem>>) attributes {dimension_semantics = [#tpu.dimension_semantics<parallel>], iteration_bounds = array<i64: 2>, scalar_prefetch = 0 : i64, scratch_operands = 0 : i64, tpu.core_type = #tpu.core_type<tc>, window_params = [{transform_indices = @transform_0, window_bounds = array<i64: 1, 4, 256>}, {pipeline_mode = #tpu.pipeline_mode<synchronous>, transform_indices = @transform_1, window_bounds = array<i64: 4, 4>}, {pipeline_mode = #tpu.pipeline_mode<synchronous>, transform_indices = @transform_2, window_bounds = array<i64: 4, 4>}, {transform_indices = @transform_3, window_bounds = array<i64: 1, 4, 256>}]} {
    %c0 = arith.constant 0 : index
    %c0_0 = arith.constant 0 : index
    %c0_1 = arith.constant 0 : index
    %0 = vector.load %arg1[%c0, %c0_0, %c0_1] : memref<1x4x256xf32, #tpu.memory_space<vmem>>, vector<1x4x256xf32>
    %cst = arith.constant dense<0.000000e+00> : vector<1x4xf32>
    %1 = vector.multi_reduction <add>, %0, %cst [2] : vector<1x4x256xf32> to vector<1x4xf32>
    %cst_2 = arith.constant 2.560000e+02 : f32
    %2 = vector.broadcast %cst_2 : f32 to vector<1x4xf32>
    %3 = arith.divf %1, %2 : vector<1x4xf32>
    %c0_3 = arith.constant 0 : index
    %c0_4 = arith.constant 0 : index
    %4 = vector.load %arg2[%c0_3, %c0_4] : memref<4x4xf32, #tpu.memory_space<vmem>>, vector<4x4xf32>
    %cst_5 = arith.constant dense<0.000000e+00> : vector<1x4xf32>
    %5 = tpu.matmul %3, %4, %cst_5 {dimension_numbers = #tpu.dot_dimension_numbers<[1], [0], [0], [1], [0, 0, 1, 1], [], []>} : vector<1x4xf32>, vector<4x4xf32>, vector<1x4xf32> -> vector<1x4xf32>
    %cst_6 = arith.constant 0.000000e+00 : f32
    %6 = vector.broadcast %cst_6 : f32 to vector<1x4xf32>
    %7 = arith.maximumf %5, %6 : vector<1x4xf32>
    %c0_7 = arith.constant 0 : index
    %c0_8 = arith.constant 0 : index
    %8 = vector.load %arg3[%c0_7, %c0_8] : memref<4x4xf32, #tpu.memory_space<vmem>>, vector<4x4xf32>
    %cst_9 = arith.constant dense<0.000000e+00> : vector<1x4xf32>
    %9 = tpu.matmul %7, %8, %cst_9 {dimension_numbers = #tpu.dot_dimension_numbers<[1], [0], [0], [1], [0, 0, 1, 1], [], []>} : vector<1x4xf32>, vector<4x4xf32>, vector<1x4xf32> -> vector<1x4xf32>
    %10 = arith.negf %9 : vector<1x4xf32>
    %11 = math.exp %10 : vector<1x4xf32>
    %cst_10 = arith.constant 1.000000e+00 : f32
    %12 = vector.broadcast %cst_10 : f32 to vector<1x4xf32>
    %13 = arith.addf %12, %11 : vector<1x4xf32>
    %14 = arith.divf %12, %13 : vector<1x4xf32>
    %15 = vector.shape_cast %14 : vector<1x4xf32> to vector<1x4x1xf32>
    %16 = vector.broadcast %15 : vector<1x4x1xf32> to vector<1x4x256xf32>
    %17 = arith.mulf %0, %16 : vector<1x4x256xf32>
    %c0_11 = arith.constant 0 : index
    %c0_12 = arith.constant 0 : index
    %c0_13 = arith.constant 0 : index
    %18 = vector.load %arg4[%c0_11, %c0_12, %c0_13] : memref<1x4x256xf32, #tpu.memory_space<vmem>>, vector<1x4x256xf32>
    tpu.vector_store %arg4[%c0_11, %c0_12, %c0_13], %17 {strides = array<i32>} : memref<1x4x256xf32, #tpu.memory_space<vmem>>, vector<1x4x256xf32>,
    return
  }
  func.func @transform_0(%arg0: i32) -> (i32, i32, i32) {
    %c0_i32 = arith.constant 0 : i32
    %c0_i32_0 = arith.constant 0 : i32
    %c0_i32_1 = arith.constant 0 : i32
    return %arg0, %c0_i32, %c0_i32_0 : i32, i32, i32
  }
  func.func @transform_1(%arg0: i32) -> (i32, i32) {
    %c0_i32 = arith.constant 0 : i32
    %c0_i32_0 = arith.constant 0 : i32
    %c0_i32_1 = arith.constant 0 : i32
    return %c0_i32, %c0_i32_0 : i32, i32
  }
  func.func @transform_2(%arg0: i32) -> (i32, i32) {
    %c0_i32 = arith.constant 0 : i32
    %c0_i32_0 = arith.constant 0 : i32
    %c0_i32_1 = arith.constant 0 : i32
    return %c0_i32, %c0_i32_0 : i32, i32
  }
  func.func @transform_3(%arg0: i32) -> (i32, i32, i32) {
    %c0_i32 = arith.constant 0 : i32
    %c0_i32_0 = arith.constant 0 : i32
    %c0_i32_1 = arith.constant 0 : i32
    return %arg0, %c0_i32, %c0_i32_0 : i32, i32, i32
  }
}

</mosaic_0001>

<bundles_post_ra>
// kernel: tpu_custom_call.1
= control target key start
LH: loop header
LB: loop body
LE: loop exit
PB: predicated region body
PF: predicated region fallthrough
CT: control target
= control target key end

     0   :  { %8 = vsyncpa [#allocation3], 0  ;;  %s963_s0 = inlined_call_operand.hbm [shape: f32[2,4,256], index: 0, kind: input, shape index: {}]   ;;  %s964_s1 = inlined_call_operand.hbm [shape: f32[4,4], index: 1, kind: input, shape index: {}]   ;;  %s965_s2 = inlined_call_operand.vmem [shape: f32[4,4], index: 2, kind: input, shape index: {}]   ;;  %s966_s3 = inlined_call_operand.hbm [shape: f32[2,4,256], index: 3, kind: output, shape index: {}]  }
   0x1   :  { %10 = vsyncpa [#allocation3 + $0x1], 0 }
   0x2   :  { %11 = vsyncpa [#allocation6], 0 }
   0x3   :  { %12 = vsyncpa [#allocation4], 0 }
   0x4   :  { %14 = vsyncpa [#allocation4 + $0x1], 0  ;;  %s751_s12 = smov 0   ;;  %s753_s13 = smov 0  }
   0x5   :  { %s755_s14 = smov 0   ;;  %s757_s15 = smov 0  }
   0x6 LB: > { %s772_s16 = sadd.s32 4294967295, %s723_s15   ;;  %s493_s17 = sadd.s32 4294967294, %s723_s15   ;;  %s723_s15 = sphi %s757_s15, %s990_s15   ;;  %s719_s14 = sphi %s755_s14, %s989_s14   ;;  %s715_s13 = sphi %s753_s13, %s988_s13   ;;  %s711_s12 = sphi %s751_s12, %s987_s12  }
   0x7   : > { %p40_p0 = scmp.ne.s32.totalorder %s715_s13, %s711_s12  ;;  %p967_p1 = scmp.eq.s32.totalorder %s772_s16, 0 }
   0x8   : > { %p112_p3 = scmp.eq.s32.totalorder %s493_s17, 1  ;;  %p494_p5 = scmp.ge.s32.totalorder %s723_s15, 1 }
   0x9   : > { %p781_p4 = por %p967_p1, %p40_p0  ;;  %p119_p7 = scmp.lt.s32.totalorder %s723_s15, 3 }
   0xa   : > { %p786_p6 = por %p112_p3, %p40_p0  ;;  %s725_s21 = smov [#allocation5]  }
   0xb   : > { %s970_s18 = scalar_select %p781_p4, 1, 0 }
   0xc   : > { %s971_s19 = scalar_select %p786_p6, 1, 0 }
   0xd   : > { %p791_p8 = pnand %p494_p5, %p119_p7  ;;  %s132_s22 = sshll.u32 %s725_s21, 4  ;;  %s133_s22 = int_to_ptr.vmem [resolvable:$true] %s132_s22 }
   0xe   : > { %s799_s23 = sadd.s32 1, %s723_s15   ;;  %s27_s27 = sadd.s32 1, %s719_s14 }
   0xf   : > { %s972_s20 = scalar_select %p791_p8, 1, 0 }
  0x10   : > { %p538_p10 = pneg %p791_p8  ;;  %s24_s25 = ssub.s32 %s723_s15, %s799_s23 }
  0x11   : > { %p809_p12 = scmp.eq.s32.totalorder %s24_s25, 0  ;;  %s595_s30 = scalar_lea.hbm %s964_s1, 64 }
  0x12   : > { %p803_p11 = pnand %p538_p10, %p967_p1  ;;  %p596_p0 = scmp.ne.s32.totalorder %s964_s1, %s595_s30 }
  0x13   : > { %s974_s26 = scalar_select %p809_p12, 1, 0 }
  0x14   : > { %p597_p3 = pneg %p803_p11  ;;  %p602_p10 = scmp.lt.u32.totalorder %s595_s30, %s964_s1 }
  0x16   : > { %p598_p5 = pnand %p597_p3, %p596_p0 }
  0x18   : > { %p599_p7 = pneg %p598_p5 }
  0x1a   : > { %p604_p9 = pnand %p602_p10, %p599_p7 }
  0x1c   : > { %607 = shalt.err (!%p604_p9)
}
  0x1d   : > { %s608_s8 = scalar_lea.vmem %s133_s22, 64  ;;  %p616_p6 = scmp.lt.s32.totalorder %s133_s22, %s133_s22 }
  0x1e   : > { %p609_p1 = scmp.ne.s32.totalorder %s133_s22, %s608_s8  ;;  %p617_p4 = scmp.lt.s32.totalorder %s608_s8, %s608_s8 }
  0x20   : > { %p611_p2 = pnand %p609_p1, %p597_p3  ;;  %p618_p8 = por %p617_p4, %p616_p6 }
  0x22   : > { %p612_p13 = pneg %p611_p2 }
  0x24   : > { %p619_p12 = pnand %p618_p8, %p612_p13 }
  0x26   : > { %622 = shalt.err (!%p619_p12)
}
  0x27   : > { %541 = dma.hbm_to_vmem [thread:$0]  (!%p803_p11), %s964_s1, 64, %s133_s22, [#allocation6]  }
  0x28   : > { %p975_p1 = scmp.ne.s32.totalorder %s974_s26, 0  ;;  %p35_p2 = scmp.eq.s32.totalorder %s723_s15, 0 }
  0x29   : > { %p976_p4 = scmp.ne.s32.totalorder %s719_s14, %s715_s13  ;;  %p977_p6 = scmp.eq.s32.totalorder %s772_s16, 1 }
  0x2a   : > { %s835_s11 = scalar_select %p975_p1, %s719_s14, %s27_s27  }
  0x2b   : > { %p843_p8 = por %p977_p6, %p976_p4  ;;  %p551_p9 = scmp.lt.s32.totalorder %s723_s15, 2 }
  0x2c   : > { %s146_s21 = sand.u32 1, %s719_s14   ;;  %p979_p12 = pmov %p976_p4 }
  0x2d   : > { %s497_s24 = sshll.u32 %s146_s21, 3  ;;  %s514_s25 = sshll.u32 %s723_s15, 7 }
  0x2e   : > { %p36_p13 = por %p35_p2, %p979_p12  ;;  %s856_s22 = scalar_lea.hbm %s963_s0, %s514_s25 }
  0x2f   : > { %s150_s26 = scalar_lea.vmem [#allocation2], %s497_s24  ;;  %s147_s4 = scalar_lea.sflag [#allocation3], %s146_s21 }
  0x30   : > { %s158_s27 = sshll.u32 %s150_s26, 4  ;;  %p858_p11 = pnand %p551_p9, %p36_p13  ;;  %s862_s27 = int_to_ptr.vmem [resolvable:$true] %s158_s27 }
  0x31   : > { %s623_s5 = scalar_lea.hbm %s856_s22, 128  ;;  %s628_s8 = scalar_lea.hbm %s963_s0, 256 }
  0x32   : > { %p624_p0 = scmp.ne.s32.totalorder %s856_s22, %s623_s5  ;;  %p625_p3 = pneg %p858_p11 }
  0x33   : > { %p629_p10 = scmp.lt.u32.totalorder %s856_s22, %s963_s0  ;;  %p630_p1 = scmp.lt.u32.totalorder %s628_s8, %s623_s5 }
  0x34   : > { %p626_p5 = pnand %p625_p3, %p624_p0  ;;  %p632_p4 = scmp.lt.u32.totalorder %s623_s5, %s856_s22 }
  0x35   : > { %p631_p2 = por %p630_p1, %p629_p10 }
  0x36   : > { %p627_p7 = pneg %p626_p5 }
  0x37   : > { %p633_p6 = por %p632_p4, %p631_p2 }
  0x39   : > { %p634_p9 = pnand %p633_p6, %p627_p7 }
  0x3b   : > { %637 = shalt.err (!%p634_p9)
}
  0x3c   : > { %s638_s21 = scalar_lea.vmem %s862_s27, 128  ;;  %s726_s24 = smov [#allocation2]  }
  0x3d   : > { %p639_p12 = scmp.ne.s32.totalorder %s862_s27, %s638_s21  ;;  %s643_s25 = sshll.u32 %s726_s24, 4  ;;  %s644_s25 = int_to_ptr.vmem [resolvable:$false] %s643_s25 }
  0x3e   : > { %s645_s28 = scalar_lea.vmem %s644_s25, 256  ;;  %p646_p5 = scmp.lt.s32.totalorder %s862_s27, %s644_s25 }
  0x3f   : > { %p641_p13 = pnand %p639_p12, %p625_p3  ;;  %p647_p10 = scmp.lt.s32.totalorder %s645_s28, %s638_s21 }
  0x41   : > { %p642_p0 = pneg %p641_p13  ;;  %p648_p1 = por %p647_p10, %p646_p5 }
  0x43   : > { %p649_p2 = pnand %p648_p1, %p642_p0 }
  0x45   : > { %652 = shalt.err (!%p649_p2)
}
  0x46   : > { %545 = dma.hbm_to_vmem [thread:$0]  (!%p858_p11), %s856_s22, 128, %s862_s27, %s147_s4  }
  0x47   : > { %p981_p7 = scmp.ne.s32.totalorder %s972_s20, 0 }
  0x48   : > { %s892_s29 = sand.u32 (!%p981_p7), 1, %s715_s13   ;;  %p982_p3 = scmp.ne.s32.totalorder (!%p981_p7), %s970_s18, 0 }
  0x49   : > { %167 = sbr.rel (%p981_p7) target bundleno = 823 (0x337), region = 32  ;;  %s501_s26 = sshll.u32 (!%p981_p7), %s892_s29, 3 }
  0x4a   : > { %s170_s5 = scalar_lea.sflag (!%p981_p7), [#allocation3], %s892_s29  ;;  %s173_s6 = scalar_lea.vmem (!%p981_p7), [#allocation2], %s501_s26 }
  0x50   : > { %698 = dma.done.wait (%p982_p3), %s170_s5, 128  }
  0x51   : > { %700 = vsyncadd (%p982_p3), %s170_s5, 4294967168  ;;  %p983_p11 = scmp.eq.s32.totalorder %s772_s16, 0 }
  0x53   : > { %702 = dma.done.wait (%p983_p11), [#allocation6], 64   ;;  %p984_p4 = pmov %p983_p11 }
  0x54   : > { %vm204_vm0 = vcmask 1043456   ;;  %v200_v0 = vld [vmem:[%s173_s6] sm:$0xff]  ;;  %v727_v5 = vmov 0.0   ;;  %v212_v6 = vld [vmem:[#allocation5] sm:$0xf]  ;;  %vm728_vm1 = vmmov 0   ;;  %v214_v7 = vlaneseq }
  0x55   : > { %704 = vsyncadd (%p984_p4), [#allocation6], 4294967232  ;;  %v202_v1 = vcombine.high %v200_v0, %v200_v0  ;;  %v205_v2 = vsel %vm204_vm0, %v200_v0, 0.0  ;;  %520 = vmatprep.subr.mxu0 %v727_v5  ;;  %525 = vmatprep.subr.mxu1 %v727_v5  ;;  %vm220_vm2 = vcmask 31744   ;;  %v297_v14 = vld [vmem:[%s965_s2] sm:$0xf] }
  0x56   : > { %521 = vmatpush3.msk.msra.mxu0 %vm204_vm0, %v212_v6  ;;  %522 = vmatprep.mubr.msk.f32.mxu0 %vm728_vm1, %v727_v5  ;;  %v215_v8 = vand.u32 127, %v214_v7  ;;  %v217_v9 = vshrl.u32 %v214_v7, 7  ;;  %v729_v26 = vmov 839922192   ;;  %s515_s22 = sshll.u32 %s772_s16, 7  ;;  %s199_s27 = scalar_lea.vmem [#allocation7], %s501_s26 }
  0x57   : > { %v206_v3 = vsel %vm204_vm0, %v202_v1, 0.0  ;;  %527 = vmatprep.mubr.msk.f32.mxu1 %vm728_vm1, %v727_v5  ;;  %526 = vmatpush3.msk.msra.mxu1 %vm204_vm0, %v297_v14  ;;  %v389_v27 = vunpack.c.l.s4 %v729_v26  ;;  %s413_s30 = sshll.u32 %s199_s27, 4  ;;  %s919_s8 = scalar_lea.hbm %s966_s3, %s515_s22  ;;  %s921_s30 = int_to_ptr.vmem [resolvable:$true] %s413_s30 }
  0x58   : > { %v207_v4 = vadd.f32 %v206_v3, %v205_v2  ;;  %v218_v10 = vsub.s32 %v215_v8, %v217_v9  ;;  %v382_v23 = vsub.s32 0, %v217_v9  ;;  %s399_s9 = scalar_lea.sflag [#allocation4], %s892_s29  ;;  %s653_s10 = scalar_lea.vmem %s921_s30, 128 }
  0x59   : > { %v390_v28 = vunpack.c.0.s8 %v389_v27  ;;  %p654_p6 = scmp.ne.s32.totalorder %s921_s30, %s653_s10  ;;  %s730_s16 = smov [#allocation7]  }
  0x5a   : > { %208 = vadd.xlane.f32.xlu0 %v207_v4  ;;  %s657_s21 = sshll.u32 %s730_s16, 4  ;;  %s658_s21 = int_to_ptr.vmem [resolvable:$false] %s657_s21 }
  0x5b   : > { %v393_v29 = vsub.s32 %v390_v28, %v217_v9  ;;  %p655_p9 = pnand %p654_p6, %p843_p8  ;;  %s659_s24 = scalar_lea.vmem %s658_s21, 256 }
  0x5c   : > { %p660_p13 = scmp.lt.s32.totalorder %s921_s30, %s658_s21  ;;  %p661_p0 = scmp.lt.s32.totalorder %s659_s24, %s653_s10 }
  0x5d   : > { %p656_p12 = pneg %p655_p9 }
  0x5e   : > { %p662_p5 = por %p661_p0, %p660_p13 }
  0x60   : > { %p663_p10 = pnand %p662_p5, %p656_p12 }
  0xe7   : > { %v209_v11 = vpop.xlane.xlu0 %208 }
  0xe8   : > { %v211_v12 = vmul.f32 0.00390625, %v209_v11 }
  0xea   : > { %v219_v13 = vrot.slane %v211_v12, %v218_v10 }
  0xec   : > { %523 = vmatmul.mubr.msk.f32.vlgmr.msra.gmra.mrb[0].mxu0 %vm220_vm2, %v219_v13 }
 0x1bf   : > { %v292_v15 = vpop.f32.mrb[0].mxu0 }
 0x1c0   : > { %v296_v16 = vmax.f32 %v292_v15, 0.0  ;;  %v524_v17 = vpop.f32.mrb[1].mxu0 }
 0x1c2   : > { %528 = vmatmul.mubr.msk.f32.vlgmr.msra.gmra.mrb[0].mxu1 %vm220_vm2, %v296_v16 }
 0x295   : > { %v370_v18 = vpop.f32.mrb[0].mxu1 }
 0x296   : > { %v508_v19 = vmul.f32 -1.442695, %v370_v18  ;;  %v529_v20 = vpop.f32.mrb[1].mxu1 }
 0x298   : > { %591 = vpow2.f32 %v508_v19 }
 0x2a2   : > { %v592_v21 = vpop.eup %591 }
 0x2a3   : > { %v377_v22 = vadd.f32 1.0, %v592_v21 }
 0x2a5   : > { %593 = vrcp.f32 %v377_v22 }
 0x2af   : > { %v594_v24 = vpop.eup %593 }
 0x2b0   : > { %v383_v25 = vrot.slane %v594_v24, %v382_v23 }
 0x2b2   : > { %385 = vbcast.lane.b32.xlu0 %v383_v25, 256 }
 0x324   : > { %v386_v30 = vpop.permute.xlu0 %385 }
 0x325   : > { %v394_v31 = vrot.slane %v386_v30, %v393_v29 }
 0x327   : > { %v396_v32 = vmul.f32 %v394_v31, %v200_v0 }
 0x329   : > { %397 = vst [vmem:[%s199_s27] sm:$0xff] %v396_v32 }
 0x32a   : > { %666 = shalt.err (!%p663_p10)
}
 0x32b   : > { %s667_s25 = scalar_lea.hbm %s919_s8, 128  ;;  %s671_s26 = scalar_lea.hbm %s966_s3, 256 }
 0x32c   : > { %p668_p1 = scmp.ne.s32.totalorder %s919_s8, %s667_s25  ;;  %p672_p3 = scmp.lt.u32.totalorder %s919_s8, %s966_s3 }
 0x32d   : > { %p673_p11 = scmp.lt.u32.totalorder %s671_s26, %s667_s25  ;;  %p675_p6 = scmp.lt.u32.totalorder %s667_s25, %s919_s8 }
 0x32e   : > { %p669_p2 = pnand %p668_p1, %p843_p8 }
 0x32f   : > { %p674_p4 = por %p673_p11, %p672_p3 }
 0x330   : > { %p670_p7 = pneg %p669_p2 }
 0x331   : > { %p676_p9 = por %p675_p6, %p674_p4 }
 0x333   : > { %p677_p12 = pnand %p676_p9, %p670_p7 }
 0x335   : > { %680 = shalt.err (!%p677_p12)
}
 0x336   : > { %536 = dma.vmem_to_hbm [thread:$0]  (%p843_p8), %s921_s30, 128, %s919_s8, %s399_s9  }
 0x337 PF: > { %s425_s18 = sand.u32 1, %s711_s12   ;;  %p985_p13 = scmp.ne.s32.totalorder %s971_s19, 0 }
 0x338   : > { %p986_p0 = scmp.ge.s32.totalorder %s723_s15, 2  ;;  %s426_s20 = scalar_lea.sflag [#allocation4], %s425_s18 }
 0x33a   : > { %p547_p5 = pnand %p986_p0, %p985_p13 }
 0x33c   : > { %706 = dma.done.wait (!%p547_p5), %s426_s20, 128  }
 0x33d   : > { %708 = vsyncadd (!%p547_p5), %s426_s20, 4294967168  ;;  %p17_p10 = scmp.ge.s32.totalorder %s799_s23, 4   ;;  %s987_s12 = smov %s715_s13 }
 0x33e   : > { %s988_s13 = smov %s719_s14  ;;  %s989_s14 = smov %s835_s11 }
 0x33f   : > { %s990_s15 = smov %s799_s23  ;;  %19 = sbr.rel (!%p17_p10) target bundleno = 6 (0x6), region = 81 }
 0x346   :  { %431 = vsyncpa [#allocation3], 1 }
 0x347   :  { %433 = vsyncpa [#allocation3 + $0x1], 1 }
 0x348   :  { %434 = vsyncpa [#allocation6], 1 }
 0x349   :  { %435 = vsyncpa [#allocation4], 1 }
 0x34a   :  { %437 = vsyncpa [#allocation4 + $0x1], 1 }

</bundles_post_ra>
